<compile_context>
chip_gen: v5e
topology: v5e:2x2
jax: 0.10.0
libtpu: 0.0.40
codegen_flags: <defaults>
</compile_context>

<pallas_src>
import math
import jax
import jax.numpy as jnp
from jax.experimental import pallas as pl
from jax.experimental.pallas import tpu as pltpu

# ---- problem sizes (small, consistent with the module) ----
BATCH = 2
SEQ = 8
D_MODEL = 32
NUM_HEADS = 4
HEAD_DIM = D_MODEL // NUM_HEADS
D_FF = 64
OUTPUT_DIM = 32          # == D_MODEL, which lets all (32, *) weights share one slab
EPS = 1e-5

# ---- packed-weight-slab column layout (all weights pre-transposed to (in, out)) ----
C_QKV = 0                          # wqkv : (D_MODEL, 3*D_MODEL)
C_WO = C_QKV + 3 * D_MODEL         # wo   : (D_MODEL, D_MODEL)
C_WC = C_WO + D_MODEL              # wc   : (D_MODEL, OUTPUT_DIM)
C_W1 = C_WC + OUTPUT_DIM           # w1   : (OUTPUT_DIM, D_FF)
C_END = C_W1 + D_FF                # total slab width = 224

# ---- packed vector-table row layout (each row: one bias / gamma / beta, zero padded to 128) ----
R_BQKV, R_BO, R_G1, R_BE1, R_BC, R_GC, R_BEC, R_BF1, R_BF2, R_G2, R_BE2 = range(11)
VEC_ROWS = 11
VEC_WIDTH = 128


def _layernorm(x, g, b):
    mean = jnp.mean(x, axis=-1, keepdims=True)
    var = jnp.mean((x - mean) ** 2, axis=-1, keepdims=True)
    return (x - mean) * jax.lax.rsqrt(var + EPS) * g + b


def encoder_kernel(x_ref, wslab_ref, w2_ref, vec_ref, out_ref, attw_ref):
    x = x_ref[...]                       # (B*S, D) -- batch folded into sublanes
    W = wslab_ref[...]                   # (32, 224) packed weight slab (already (in, out))
    w2 = w2_ref[...]                     # (D_FF, OUTPUT_DIM)
    V = vec_ref[...]                     # (11, 128) packed biases / LN params

    wqkv = W[:, C_QKV:C_WO]              # (D, 3D)
    wo = W[:, C_WO:C_WC]                 # (D, D)
    wc = W[:, C_WC:C_W1]                 # (D, OUT)
    w1 = W[:, C_W1:C_END]                # (OUT, FF)

    def vrow(i, n):                      # (1, n) slice of the packed vector table
        return V[i:i + 1, :n]

    bqkv = vrow(R_BQKV, 3 * D_MODEL)
    bo = vrow(R_BO, D_MODEL)
    g1, be1 = vrow(R_G1, D_MODEL), vrow(R_BE1, D_MODEL)
    bc = vrow(R_BC, OUTPUT_DIM)
    gc, bec = vrow(R_GC, OUTPUT_DIM), vrow(R_BEC, OUTPUT_DIM)
    bf1 = vrow(R_BF1, D_FF)
    bf2 = vrow(R_BF2, OUTPUT_DIM)
    g2, be2 = vrow(R_G2, OUTPUT_DIM), vrow(R_BE2, OUTPUT_DIM)

    # ---- fused QKV projection: one MXU matmul instead of three ----
    qkv = jnp.dot(x, wqkv, preferred_element_type=jnp.float32) + bqkv   # (B*S, 3D)

    # ---- gather the (B*H, S, HEAD_DIM) head-major stacks (static slices + one stack each) ----
    def head_stack(col0):
        slabs = []
        for b in range(BATCH):
            for h in range(NUM_HEADS):
                slabs.append(qkv[b * SEQ:(b + 1) * SEQ,
                                 col0 + h * HEAD_DIM: col0 + (h + 1) * HEAD_DIM])
        return jnp.stack(slabs, axis=0)          # (B*H, S, HEAD_DIM)

    qh = head_stack(0)
    kh = head_stack(D_MODEL)
    vh = head_stack(2 * D_MODEL)

    # ---- batched scaled-dot-product attention: 2 einsums for all batches & heads ----
    scale = 1.0 / math.sqrt(HEAD_DIM)
    s = jnp.einsum("nsd,ntd->nst", qh, kh,
                   preferred_element_type=jnp.float32) * scale          # (B*H, S, S)
    s = s - jnp.max(s, axis=-1, keepdims=True)
    e = jnp.exp(s)
    denom = jnp.sum(e, axis=-1, keepdims=True)
    aw = e * pl.reciprocal(denom, approx=True)                          # (B*H, S, S)

    # single store of all attention weights (leading-dim-only reshape, no lane relayout)
    attw_ref[...] = aw.reshape(BATCH, NUM_HEADS, SEQ, SEQ)

    o = jnp.einsum("nst,ntd->nsd", aw, vh,
                   preferred_element_type=jnp.float32)                  # (B*H, S, HEAD_DIM)

    # ---- re-assemble (B*S, D): rows by batch, lanes by head ----
    attn = jnp.concatenate(
        [jnp.concatenate([o[b * NUM_HEADS + h] for h in range(NUM_HEADS)], axis=-1)
         for b in range(BATCH)],
        axis=0)                                                          # (B*S, D)

    attn = jnp.dot(attn, wo, preferred_element_type=jnp.float32) + bo

    # residual + norm1  (dropout == identity)
    x1 = _layernorm(x + attn, g1, be1)

    # convert + ReLU + layernorm_convert
    c = jnp.dot(x1, wc, preferred_element_type=jnp.float32) + bc
    c = jnp.maximum(c, 0.0)
    c = _layernorm(c, gc, bec)

    # feedforward: fc2(relu(fc1(c)))   (internal dropout == identity)
    h1 = jnp.maximum(jnp.dot(c, w1, preferred_element_type=jnp.float32) + bf1, 0.0)
    ff = jnp.dot(h1, w2, preferred_element_type=jnp.float32) + bf2

    # residual + norm2  (dropout == identity)
    y = _layernorm(c + ff, g2, be2)
    out_ref[...] = y.astype(out_ref.dtype)


def pack_params(p):
    """Host-side (free) layout plumbing: pre-transpose weights, fuse QKV, pack everything."""
    # All of wqkv/wo/wc/w1 have D_MODEL(==OUTPUT_DIM)==32 input rows -> one slab.
    wqkv = jnp.concatenate([p["wq"].T, p["wk"].T, p["wv"].T], axis=1)      # (D, 3D)
    wslab = jnp.concatenate([wqkv, p["wo"].T, p["wc"].T, p["w1"].T], axis=1)  # (32, 224)
    w2 = p["w2"].T                                                          # (FF, OUT)

    rows = [
        (R_BQKV, jnp.concatenate([p["bq"][0], p["bk"][0], p["bv"][0]])),
        (R_BO, p["bo"][0]), (R_G1, p["g1"][0]), (R_BE1, p["be1"][0]),
        (R_BC, p["bc"][0]), (R_GC, p["gc"][0]), (R_BEC, p["bec"][0]),
        (R_BF1, p["bf1"][0]), (R_BF2, p["bf2"][0]),
        (R_G2, p["g2"][0]), (R_BE2, p["be2"][0]),
    ]
    vecs = jnp.zeros((VEC_ROWS, VEC_WIDTH), jnp.float32)
    for i, v in rows:
        vecs = vecs.at[i, : v.shape[0]].set(v)
    return wslab, w2, vecs


def transformer_encoder_layer(x, packed):
    """x: (B, S, D_MODEL) f32. Returns (output (B,S,OUTPUT_DIM), attn_weights (B,H,S,S))."""
    B, S, D = x.shape
    wslab, w2, vecs = packed
    x2 = x.reshape(B * S, D)                 # fold batch into the row/sublane dim

    vmem = pl.BlockSpec(memory_space=pltpu.MemorySpace.VMEM)   # whole array resident in VMEM
    out2, attw = pl.pallas_call(
        encoder_kernel,
        out_shape=(
            jax.ShapeDtypeStruct((B * S, OUTPUT_DIM), jnp.float32),
            jax.ShapeDtypeStruct((B, NUM_HEADS, S, S), jnp.float32),
        ),
        in_specs=[vmem, vmem, vmem, vmem],
        out_specs=(vmem, vmem),
    )(x2, wslab, w2, vecs)
    return out2.reshape(B, S, OUTPUT_DIM), attw


# ---------------- pure-JAX reference (for correctness check) ----------------
def reference(x, p):
    def lin(z, w, b):
        return z @ w.T + b[0]

    B, S, D = x.shape
    q = lin(x, p["wq"], p["bq"]).reshape(B, S, NUM_HEADS, HEAD_DIM).transpose(0, 2, 1, 3)
    k = lin(x, p["wk"], p["bk"]).reshape(B, S, NUM_HEADS, HEAD_DIM).transpose(0, 2, 1, 3)
    v = lin(x, p["wv"], p["bv"]).reshape(B, S, NUM_HEADS, HEAD_DIM).transpose(0, 2, 1, 3)
    s = jnp.einsum("bhqd,bhkd->bhqk", q, k) / math.sqrt(HEAD_DIM)
    aw = jax.nn.softmax(s, axis=-1)
    o = jnp.einsum("bhqk,bhkd->bhqd", aw, v).transpose(0, 2, 1, 3).reshape(B, S, D)
    o = lin(o, p["wo"], p["bo"])
    x1 = _layernorm(x + o, p["g1"][0], p["be1"][0])
    c = jax.nn.relu(lin(x1, p["wc"], p["bc"]))
    c = _layernorm(c, p["gc"][0], p["bec"][0])
    ff = lin(jax.nn.relu(lin(c, p["w1"], p["bf1"])), p["w2"], p["bf2"])
    y = _layernorm(c + ff, p["g2"][0], p["be2"][0])
    return y, aw


def init_params(key):
    keys = jax.random.split(key, 16)
    sd = 0.05
    return {
        "wq": jax.random.normal(keys[0], (D_MODEL, D_MODEL), jnp.float32) * sd,
        "bq": jax.random.normal(keys[1], (1, D_MODEL), jnp.float32) * sd,
        "wk": jax.random.normal(keys[2], (D_MODEL, D_MODEL), jnp.float32) * sd,
        "bk": jax.random.normal(keys[3], (1, D_MODEL), jnp.float32) * sd,
        "wv": jax.random.normal(keys[4], (D_MODEL, D_MODEL), jnp.float32) * sd,
        "bv": jax.random.normal(keys[5], (1, D_MODEL), jnp.float32) * sd,
        "wo": jax.random.normal(keys[6], (D_MODEL, D_MODEL), jnp.float32) * sd,
        "bo": jax.random.normal(keys[7], (1, D_MODEL), jnp.float32) * sd,
        "g1": jnp.ones((1, D_MODEL), jnp.float32),
        "be1": jnp.zeros((1, D_MODEL), jnp.float32),
        "wc": jax.random.normal(keys[8], (OUTPUT_DIM, D_MODEL), jnp.float32) * sd,
        "bc": jax.random.normal(keys[9], (1, OUTPUT_DIM), jnp.float32) * sd,
        "gc": jnp.ones((1, OUTPUT_DIM), jnp.float32),
        "bec": jnp.zeros((1, OUTPUT_DIM), jnp.float32),
        "w1": jax.random.normal(keys[10], (D_FF, OUTPUT_DIM), jnp.float32) * sd,
        "bf1": jax.random.normal(keys[11], (1, D_FF), jnp.float32) * sd,
        "w2": jax.random.normal(keys[12], (OUTPUT_DIM, D_FF), jnp.float32) * sd,
        "bf2": jax.random.normal(keys[13], (1, OUTPUT_DIM), jnp.float32) * sd,
        "g2": jnp.ones((1, OUTPUT_DIM), jnp.float32),
        "be2": jnp.zeros((1, OUTPUT_DIM), jnp.float32),
    }


if __name__ == "__main__":
    key = jax.random.PRNGKey(0)
    kx, kp = jax.random.split(key)
    x = jax.random.normal(kx, (BATCH, SEQ, D_MODEL), jnp.float32)
    params = init_params(kp)

    packed = pack_params(params)                     # one-time host-side packing
    out, attw = transformer_encoder_layer(x, packed)
    out = jax.block_until_ready(out)
    attw = jax.block_until_ready(attw)

    ref_out, ref_attw = reference(x, params)
    # Tolerance relaxed slightly vs 1e-4 because the kernel softmax uses the EUP
    # approximate reciprocal (pl.reciprocal(..., approx=True)).
    assert jnp.allclose(out, ref_out, atol=2e-3, rtol=2e-3), "output mismatch"
    assert jnp.allclose(attw, ref_attw, atol=2e-3, rtol=2e-3), "attention weights mismatch"

    print("KERNEL_OK")
</pallas_src>

<mosaic_0001>
module attributes {stable_mosaic.version = 11 : i64} {
  func.func @encoder_kernel(%arg0: memref<16x32xf32, #tpu.memory_space<vmem>>, %arg1: memref<32x224xf32, #tpu.memory_space<vmem>>, %arg2: memref<64x32xf32, #tpu.memory_space<vmem>>, %arg3: memref<11x128xf32, #tpu.memory_space<vmem>>, %arg4: memref<16x32xf32, #tpu.memory_space<vmem>>, %arg5: memref<2x4x8x8xf32, #tpu.memory_space<vmem>>) attributes {dimension_semantics = [], scalar_prefetch = 0 : i64, scratch_operands = 0 : i64, tpu.core_type = #tpu.core_type<tc>} {
    %c0 = arith.constant 0 : index
    %c0_0 = arith.constant 0 : index
    %0 = vector.load %arg0[%c0, %c0_0] : memref<16x32xf32, #tpu.memory_space<vmem>>, vector<16x32xf32>
    %c0_1 = arith.constant 0 : index
    %c0_2 = arith.constant 0 : index
    %1 = vector.load %arg1[%c0_1, %c0_2] : memref<32x224xf32, #tpu.memory_space<vmem>>, vector<32x224xf32>
    %c0_3 = arith.constant 0 : index
    %c0_4 = arith.constant 0 : index
    %2 = vector.load %arg2[%c0_3, %c0_4] : memref<64x32xf32, #tpu.memory_space<vmem>>, vector<64x32xf32>
    %c0_5 = arith.constant 0 : index
    %c0_6 = arith.constant 0 : index
    %3 = vector.load %arg3[%c0_5, %c0_6] : memref<11x128xf32, #tpu.memory_space<vmem>>, vector<11x128xf32>
    %4 = vector.extract_strided_slice %1 {offsets = [0, 0], sizes = [32, 96], strides = [1, 1]} : vector<32x224xf32> to vector<32x96xf32>
    %5 = vector.extract_strided_slice %1 {offsets = [0, 96], sizes = [32, 32], strides = [1, 1]} : vector<32x224xf32> to vector<32x32xf32>
    %6 = vector.extract_strided_slice %1 {offsets = [0, 128], sizes = [32, 32], strides = [1, 1]} : vector<32x224xf32> to vector<32x32xf32>
    %7 = vector.extract_strided_slice %1 {offsets = [0, 160], sizes = [32, 64], strides = [1, 1]} : vector<32x224xf32> to vector<32x64xf32>
    %8 = vector.extract_strided_slice %3 {offsets = [0, 0], sizes = [1, 96], strides = [1, 1]} : vector<11x128xf32> to vector<1x96xf32>
    %9 = vector.extract_strided_slice %3 {offsets = [1, 0], sizes = [1, 32], strides = [1, 1]} : vector<11x128xf32> to vector<1x32xf32>
    %10 = vector.extract_strided_slice %3 {offsets = [2, 0], sizes = [1, 32], strides = [1, 1]} : vector<11x128xf32> to vector<1x32xf32>
    %11 = vector.extract_strided_slice %3 {offsets = [3, 0], sizes = [1, 32], strides = [1, 1]} : vector<11x128xf32> to vector<1x32xf32>
    %12 = vector.extract_strided_slice %3 {offsets = [4, 0], sizes = [1, 32], strides = [1, 1]} : vector<11x128xf32> to vector<1x32xf32>
    %13 = vector.extract_strided_slice %3 {offsets = [5, 0], sizes = [1, 32], strides = [1, 1]} : vector<11x128xf32> to vector<1x32xf32>
    %14 = vector.extract_strided_slice %3 {offsets = [6, 0], sizes = [1, 32], strides = [1, 1]} : vector<11x128xf32> to vector<1x32xf32>
    %15 = vector.extract_strided_slice %3 {offsets = [7, 0], sizes = [1, 64], strides = [1, 1]} : vector<11x128xf32> to vector<1x64xf32>
    %16 = vector.extract_strided_slice %3 {offsets = [8, 0], sizes = [1, 32], strides = [1, 1]} : vector<11x128xf32> to vector<1x32xf32>
    %17 = vector.extract_strided_slice %3 {offsets = [9, 0], sizes = [1, 32], strides = [1, 1]} : vector<11x128xf32> to vector<1x32xf32>
    %18 = vector.extract_strided_slice %3 {offsets = [10, 0], sizes = [1, 32], strides = [1, 1]} : vector<11x128xf32> to vector<1x32xf32>
    %cst = arith.constant dense<0.000000e+00> : vector<16x96xf32>
    %19 = tpu.matmul %0, %4, %cst {dimension_numbers = #tpu.dot_dimension_numbers<[1], [0], [0], [1], [0, 0, 1, 1], [], []>} : vector<16x32xf32>, vector<32x96xf32>, vector<16x96xf32> -> vector<16x96xf32>
    %20 = vector.broadcast %8 : vector<1x96xf32> to vector<16x96xf32>
    %21 = arith.addf %19, %20 : vector<16x96xf32>
    %22 = vector.extract_strided_slice %21 {offsets = [0, 0], sizes = [8, 8], strides = [1, 1]} : vector<16x96xf32> to vector<8x8xf32>
    %23 = vector.extract_strided_slice %21 {offsets = [0, 8], sizes = [8, 8], strides = [1, 1]} : vector<16x96xf32> to vector<8x8xf32>
    %24 = vector.extract_strided_slice %21 {offsets = [0, 16], sizes = [8, 8], strides = [1, 1]} : vector<16x96xf32> to vector<8x8xf32>
    %25 = vector.extract_strided_slice %21 {offsets = [0, 24], sizes = [8, 8], strides = [1, 1]} : vector<16x96xf32> to vector<8x8xf32>
    %26 = vector.extract_strided_slice %21 {offsets = [8, 0], sizes = [8, 8], strides = [1, 1]} : vector<16x96xf32> to vector<8x8xf32>
    %27 = vector.extract_strided_slice %21 {offsets = [8, 8], sizes = [8, 8], strides = [1, 1]} : vector<16x96xf32> to vector<8x8xf32>
    %28 = vector.extract_strided_slice %21 {offsets = [8, 16], sizes = [8, 8], strides = [1, 1]} : vector<16x96xf32> to vector<8x8xf32>
    %29 = vector.extract_strided_slice %21 {offsets = [8, 24], sizes = [8, 8], strides = [1, 1]} : vector<16x96xf32> to vector<8x8xf32>
    %30 = vector.shape_cast %22 : vector<8x8xf32> to vector<1x8x8xf32>
    %31 = vector.shape_cast %23 : vector<8x8xf32> to vector<1x8x8xf32>
    %32 = vector.shape_cast %24 : vector<8x8xf32> to vector<1x8x8xf32>
    %33 = vector.shape_cast %25 : vector<8x8xf32> to vector<1x8x8xf32>
    %34 = vector.shape_cast %26 : vector<8x8xf32> to vector<1x8x8xf32>
    %35 = vector.shape_cast %27 : vector<8x8xf32> to vector<1x8x8xf32>
    %36 = vector.shape_cast %28 : vector<8x8xf32> to vector<1x8x8xf32>
    %37 = vector.shape_cast %29 : vector<8x8xf32> to vector<1x8x8xf32>
    %38 = tpu.concatenate %30, %31, %32, %33, %34, %35, %36, %37 in 0 : vector<1x8x8xf32>, vector<1x8x8xf32>, vector<1x8x8xf32>, vector<1x8x8xf32>, vector<1x8x8xf32>, vector<1x8x8xf32>, vector<1x8x8xf32>, vector<1x8x8xf32> -> vector<8x8x8xf32>
    %39 = vector.extract_strided_slice %21 {offsets = [0, 32], sizes = [8, 8], strides = [1, 1]} : vector<16x96xf32> to vector<8x8xf32>
    %40 = vector.extract_strided_slice %21 {offsets = [0, 40], sizes = [8, 8], strides = [1, 1]} : vector<16x96xf32> to vector<8x8xf32>
    %41 = vector.extract_strided_slice %21 {offsets = [0, 48], sizes = [8, 8], strides = [1, 1]} : vector<16x96xf32> to vector<8x8xf32>
    %42 = vector.extract_strided_slice %21 {offsets = [0, 56], sizes = [8, 8], strides = [1, 1]} : vector<16x96xf32> to vector<8x8xf32>
    %43 = vector.extract_strided_slice %21 {offsets = [8, 32], sizes = [8, 8], strides = [1, 1]} : vector<16x96xf32> to vector<8x8xf32>
    %44 = vector.extract_strided_slice %21 {offsets = [8, 40], sizes = [8, 8], strides = [1, 1]} : vector<16x96xf32> to vector<8x8xf32>
    %45 = vector.extract_strided_slice %21 {offsets = [8, 48], sizes = [8, 8], strides = [1, 1]} : vector<16x96xf32> to vector<8x8xf32>
    %46 = vector.extract_strided_slice %21 {offsets = [8, 56], sizes = [8, 8], strides = [1, 1]} : vector<16x96xf32> to vector<8x8xf32>
    %47 = vector.shape_cast %39 : vector<8x8xf32> to vector<1x8x8xf32>
    %48 = vector.shape_cast %40 : vector<8x8xf32> to vector<1x8x8xf32>
    %49 = vector.shape_cast %41 : vector<8x8xf32> to vector<1x8x8xf32>
    %50 = vector.shape_cast %42 : vector<8x8xf32> to vector<1x8x8xf32>
    %51 = vector.shape_cast %43 : vector<8x8xf32> to vector<1x8x8xf32>
    %52 = vector.shape_cast %44 : vector<8x8xf32> to vector<1x8x8xf32>
    %53 = vector.shape_cast %45 : vector<8x8xf32> to vector<1x8x8xf32>
    %54 = vector.shape_cast %46 : vector<8x8xf32> to vector<1x8x8xf32>
    %55 = tpu.concatenate %47, %48, %49, %50, %51, %52, %53, %54 in 0 : vector<1x8x8xf32>, vector<1x8x8xf32>, vector<1x8x8xf32>, vector<1x8x8xf32>, vector<1x8x8xf32>, vector<1x8x8xf32>, vector<1x8x8xf32>, vector<1x8x8xf32> -> vector<8x8x8xf32>
    %56 = vector.extract_strided_slice %21 {offsets = [0, 64], sizes = [8, 8], strides = [1, 1]} : vector<16x96xf32> to vector<8x8xf32>
    %57 = vector.extract_strided_slice %21 {offsets = [0, 72], sizes = [8, 8], strides = [1, 1]} : vector<16x96xf32> to vector<8x8xf32>
    %58 = vector.extract_strided_slice %21 {offsets = [0, 80], sizes = [8, 8], strides = [1, 1]} : vector<16x96xf32> to vector<8x8xf32>
    %59 = vector.extract_strided_slice %21 {offsets = [0, 88], sizes = [8, 8], strides = [1, 1]} : vector<16x96xf32> to vector<8x8xf32>
    %60 = vector.extract_strided_slice %21 {offsets = [8, 64], sizes = [8, 8], strides = [1, 1]} : vector<16x96xf32> to vector<8x8xf32>
    %61 = vector.extract_strided_slice %21 {offsets = [8, 72], sizes = [8, 8], strides = [1, 1]} : vector<16x96xf32> to vector<8x8xf32>
    %62 = vector.extract_strided_slice %21 {offsets = [8, 80], sizes = [8, 8], strides = [1, 1]} : vector<16x96xf32> to vector<8x8xf32>
    %63 = vector.extract_strided_slice %21 {offsets = [8, 88], sizes = [8, 8], strides = [1, 1]} : vector<16x96xf32> to vector<8x8xf32>
    %64 = vector.shape_cast %56 : vector<8x8xf32> to vector<1x8x8xf32>
    %65 = vector.shape_cast %57 : vector<8x8xf32> to vector<1x8x8xf32>
    %66 = vector.shape_cast %58 : vector<8x8xf32> to vector<1x8x8xf32>
    %67 = vector.shape_cast %59 : vector<8x8xf32> to vector<1x8x8xf32>
    %68 = vector.shape_cast %60 : vector<8x8xf32> to vector<1x8x8xf32>
    %69 = vector.shape_cast %61 : vector<8x8xf32> to vector<1x8x8xf32>
    %70 = vector.shape_cast %62 : vector<8x8xf32> to vector<1x8x8xf32>
    %71 = vector.shape_cast %63 : vector<8x8xf32> to vector<1x8x8xf32>
    %72 = tpu.concatenate %64, %65, %66, %67, %68, %69, %70, %71 in 0 : vector<1x8x8xf32>, vector<1x8x8xf32>, vector<1x8x8xf32>, vector<1x8x8xf32>, vector<1x8x8xf32>, vector<1x8x8xf32>, vector<1x8x8xf32>, vector<1x8x8xf32> -> vector<8x8x8xf32>
    "tpu.trace_start"() <{level = 10 : i32, message = "nsd,ntd->nst"}> : () -> ()
    %cst_7 = arith.constant dense<0.000000e+00> : vector<8x8x8xf32>
    %73 = tpu.matmul %38, %55, %cst_7 {dimension_numbers = #tpu.dot_dimension_numbers<[2], [2], [1], [1], [0, 0, 0, 1, 1, 1], [0], [0]>} : vector<8x8x8xf32>, vector<8x8x8xf32>, vector<8x8x8xf32> -> vector<8x8x8xf32>
    "tpu.trace_stop"() : () -> ()
    %cst_8 = arith.constant 0.353553385 : f32
    %74 = vector.broadcast %cst_8 : f32 to vector<8x8x8xf32>
    %75 = arith.mulf %73, %74 : vector<8x8x8xf32>
    %cst_9 = arith.constant dense<0xFF800000> : vector<8x8xf32>
    %76 = vector.multi_reduction <maximumf>, %75, %cst_9 [2] : vector<8x8x8xf32> to vector<8x8xf32>
    %77 = vector.shape_cast %76 : vector<8x8xf32> to vector<8x8x1xf32>
    %78 = vector.broadcast %77 : vector<8x8x1xf32> to vector<8x8x8xf32>
    %79 = arith.subf %75, %78 : vector<8x8x8xf32>
    %80 = math.exp %79 : vector<8x8x8xf32>
    %cst_10 = arith.constant dense<0.000000e+00> : vector<8x8xf32>
    %81 = vector.multi_reduction <add>, %80, %cst_10 [2] : vector<8x8x8xf32> to vector<8x8xf32>
    %82 = vector.shape_cast %81 : vector<8x8xf32> to vector<8x8x1xf32>
    %83 = tpu.reciprocal %82 {approx = true} : vector<8x8x1xf32> -> vector<8x8x1xf32>
    %84 = vector.broadcast %83 : vector<8x8x1xf32> to vector<8x8x8xf32>
    %85 = arith.mulf %80, %84 : vector<8x8x8xf32>
    %86 = vector.shape_cast %85 : vector<8x8x8xf32> to vector<2x4x8x8xf32>
    %c0_11 = arith.constant 0 : index
    %c0_12 = arith.constant 0 : index
    %c0_13 = arith.constant 0 : index
    %c0_14 = arith.constant 0 : index
    %87 = vector.load %arg5[%c0_11, %c0_12, %c0_13, %c0_14] : memref<2x4x8x8xf32, #tpu.memory_space<vmem>>, vector<2x4x8x8xf32>
    tpu.vector_store %arg5[%c0_11, %c0_12, %c0_13, %c0_14], %86 {strides = array<i32>} : memref<2x4x8x8xf32, #tpu.memory_space<vmem>>, vector<2x4x8x8xf32>,
    "tpu.trace_start"() <{level = 10 : i32, message = "nst,ntd->nsd"}> : () -> ()
    %cst_15 = arith.constant dense<0.000000e+00> : vector<8x8x8xf32>
    %88 = tpu.matmul %85, %72, %cst_15 {dimension_numbers = #tpu.dot_dimension_numbers<[2], [1], [1], [2], [0, 0, 0, 1, 1, 2], [0], [0]>} : vector<8x8x8xf32>, vector<8x8x8xf32>, vector<8x8x8xf32> -> vector<8x8x8xf32>
    "tpu.trace_stop"() : () -> ()
    %89 = vector.extract_strided_slice %88 {offsets = [0, 0, 0], sizes = [1, 8, 8], strides = [1, 1, 1]} : vector<8x8x8xf32> to vector<1x8x8xf32>
    %90 = vector.shape_cast %89 : vector<1x8x8xf32> to vector<8x8xf32>
    %91 = vector.extract_strided_slice %88 {offsets = [1, 0, 0], sizes = [1, 8, 8], strides = [1, 1, 1]} : vector<8x8x8xf32> to vector<1x8x8xf32>
    %92 = vector.shape_cast %91 : vector<1x8x8xf32> to vector<8x8xf32>
    %93 = vector.extract_strided_slice %88 {offsets = [2, 0, 0], sizes = [1, 8, 8], strides = [1, 1, 1]} : vector<8x8x8xf32> to vector<1x8x8xf32>
    %94 = vector.shape_cast %93 : vector<1x8x8xf32> to vector<8x8xf32>
    %95 = vector.extract_strided_slice %88 {offsets = [3, 0, 0], sizes = [1, 8, 8], strides = [1, 1, 1]} : vector<8x8x8xf32> to vector<1x8x8xf32>
    %96 = vector.shape_cast %95 : vector<1x8x8xf32> to vector<8x8xf32>
    %97 = tpu.concatenate %90, %92, %94, %96 in 1 : vector<8x8xf32>, vector<8x8xf32>, vector<8x8xf32>, vector<8x8xf32> -> vector<8x32xf32>
    %98 = vector.extract_strided_slice %88 {offsets = [4, 0, 0], sizes = [1, 8, 8], strides = [1, 1, 1]} : vector<8x8x8xf32> to vector<1x8x8xf32>
    %99 = vector.shape_cast %98 : vector<1x8x8xf32> to vector<8x8xf32>
    %100 = vector.extract_strided_slice %88 {offsets = [5, 0, 0], sizes = [1, 8, 8], strides = [1, 1, 1]} : vector<8x8x8xf32> to vector<1x8x8xf32>
    %101 = vector.shape_cast %100 : vector<1x8x8xf32> to vector<8x8xf32>
    %102 = vector.extract_strided_slice %88 {offsets = [6, 0, 0], sizes = [1, 8, 8], strides = [1, 1, 1]} : vector<8x8x8xf32> to vector<1x8x8xf32>
    %103 = vector.shape_cast %102 : vector<1x8x8xf32> to vector<8x8xf32>
    %104 = vector.extract_strided_slice %88 {offsets = [7, 0, 0], sizes = [1, 8, 8], strides = [1, 1, 1]} : vector<8x8x8xf32> to vector<1x8x8xf32>
    %105 = vector.shape_cast %104 : vector<1x8x8xf32> to vector<8x8xf32>
    %106 = tpu.concatenate %99, %101, %103, %105 in 1 : vector<8x8xf32>, vector<8x8xf32>, vector<8x8xf32>, vector<8x8xf32> -> vector<8x32xf32>
    %107 = tpu.concatenate %97, %106 in 0 : vector<8x32xf32>, vector<8x32xf32> -> vector<16x32xf32>
    %cst_16 = arith.constant dense<0.000000e+00> : vector<16x32xf32>
    %108 = tpu.matmul %107, %5, %cst_16 {dimension_numbers = #tpu.dot_dimension_numbers<[1], [0], [0], [1], [0, 0, 1, 1], [], []>} : vector<16x32xf32>, vector<32x32xf32>, vector<16x32xf32> -> vector<16x32xf32>
    %109 = vector.broadcast %9 : vector<1x32xf32> to vector<16x32xf32>
    %110 = arith.addf %108, %109 : vector<16x32xf32>
    %111 = arith.addf %0, %110 : vector<16x32xf32>
    %cst_17 = arith.constant dense<0.000000e+00> : vector<16xf32>
    %112 = vector.multi_reduction <add>, %111, %cst_17 [1] : vector<16x32xf32> to vector<16xf32>
    %113 = vector.shape_cast %112 : vector<16xf32> to vector<16x1xf32>
    %cst_18 = arith.constant 3.200000e+01 : f32
    %114 = vector.broadcast %cst_18 : f32 to vector<16x1xf32>
    %115 = arith.divf %113, %114 : vector<16x1xf32>
    %116 = vector.broadcast %115 : vector<16x1xf32> to vector<16x32xf32>
    %117 = arith.subf %111, %116 : vector<16x32xf32>
    %118 = arith.mulf %117, %117 : vector<16x32xf32>
    %cst_19 = arith.constant dense<0.000000e+00> : vector<16xf32>
    %119 = vector.multi_reduction <add>, %118, %cst_19 [1] : vector<16x32xf32> to vector<16xf32>
    %120 = vector.shape_cast %119 : vector<16xf32> to vector<16x1xf32>
    %cst_20 = arith.constant 3.200000e+01 : f32
    %121 = vector.broadcast %cst_20 : f32 to vector<16x1xf32>
    %122 = arith.divf %120, %121 : vector<16x1xf32>
    %123 = vector.broadcast %115 : vector<16x1xf32> to vector<16x32xf32>
    %124 = arith.subf %111, %123 : vector<16x32xf32>
    %cst_21 = arith.constant 9.99999974E-6 : f32
    %125 = vector.broadcast %cst_21 : f32 to vector<16x1xf32>
    %126 = arith.addf %122, %125 : vector<16x1xf32>
    %127 = math.rsqrt %126 : vector<16x1xf32>
    %128 = vector.broadcast %127 : vector<16x1xf32> to vector<16x32xf32>
    %129 = arith.mulf %124, %128 : vector<16x32xf32>
    %130 = vector.broadcast %10 : vector<1x32xf32> to vector<16x32xf32>
    %131 = arith.mulf %129, %130 : vector<16x32xf32>
    %132 = vector.broadcast %11 : vector<1x32xf32> to vector<16x32xf32>
    %133 = arith.addf %131, %132 : vector<16x32xf32>
    %cst_22 = arith.constant dense<0.000000e+00> : vector<16x32xf32>
    %134 = tpu.matmul %133, %6, %cst_22 {dimension_numbers = #tpu.dot_dimension_numbers<[1], [0], [0], [1], [0, 0, 1, 1], [], []>} : vector<16x32xf32>, vector<32x32xf32>, vector<16x32xf32> -> vector<16x32xf32>
    %135 = vector.broadcast %12 : vector<1x32xf32> to vector<16x32xf32>
    %136 = arith.addf %134, %135 : vector<16x32xf32>
    %cst_23 = arith.constant 0.000000e+00 : f32
    %137 = vector.broadcast %cst_23 : f32 to vector<16x32xf32>
    %138 = arith.maximumf %136, %137 : vector<16x32xf32>
    %cst_24 = arith.constant dense<0.000000e+00> : vector<16xf32>
    %139 = vector.multi_reduction <add>, %138, %cst_24 [1] : vector<16x32xf32> to vector<16xf32>
    %140 = vector.shape_cast %139 : vector<16xf32> to vector<16x1xf32>
    %cst_25 = arith.constant 3.200000e+01 : f32
    %141 = vector.broadcast %cst_25 : f32 to vector<16x1xf32>
    %142 = arith.divf %140, %141 : vector<16x1xf32>
    %143 = vector.broadcast %142 : vector<16x1xf32> to vector<16x32xf32>
    %144 = arith.subf %138, %143 : vector<16x32xf32>
    %145 = arith.mulf %144, %144 : vector<16x32xf32>
    %cst_26 = arith.constant dense<0.000000e+00> : vector<16xf32>
    %146 = vector.multi_reduction <add>, %145, %cst_26 [1] : vector<16x32xf32> to vector<16xf32>
    %147 = vector.shape_cast %146 : vector<16xf32> to vector<16x1xf32>
    %cst_27 = arith.constant 3.200000e+01 : f32
    %148 = vector.broadcast %cst_27 : f32 to vector<16x1xf32>
    %149 = arith.divf %147, %148 : vector<16x1xf32>
    %150 = vector.broadcast %142 : vector<16x1xf32> to vector<16x32xf32>
    %151 = arith.subf %138, %150 : vector<16x32xf32>
    %cst_28 = arith.constant 9.99999974E-6 : f32
    %152 = vector.broadcast %cst_28 : f32 to vector<16x1xf32>
    %153 = arith.addf %149, %152 : vector<16x1xf32>
    %154 = math.rsqrt %153 : vector<16x1xf32>
    %155 = vector.broadcast %154 : vector<16x1xf32> to vector<16x32xf32>
    %156 = arith.mulf %151, %155 : vector<16x32xf32>
    %157 = vector.broadcast %13 : vector<1x32xf32> to vector<16x32xf32>
    %158 = arith.mulf %156, %157 : vector<16x32xf32>
    %159 = vector.broadcast %14 : vector<1x32xf32> to vector<16x32xf32>
    %160 = arith.addf %158, %159 : vector<16x32xf32>
    %cst_29 = arith.constant dense<0.000000e+00> : vector<16x64xf32>
    %161 = tpu.matmul %160, %7, %cst_29 {dimension_numbers = #tpu.dot_dimension_numbers<[1], [0], [0], [1], [0, 0, 1, 1], [], []>} : vector<16x32xf32>, vector<32x64xf32>, vector<16x64xf32> -> vector<16x64xf32>
    %162 = vector.broadcast %15 : vector<1x64xf32> to vector<16x64xf32>
    %163 = arith.addf %161, %162 : vector<16x64xf32>
    %cst_30 = arith.constant 0.000000e+00 : f32
    %164 = vector.broadcast %cst_30 : f32 to vector<16x64xf32>
    %165 = arith.maximumf %163, %164 : vector<16x64xf32>
    %cst_31 = arith.constant dense<0.000000e+00> : vector<16x32xf32>
    %166 = tpu.matmul %165, %2, %cst_31 {dimension_numbers = #tpu.dot_dimension_numbers<[1], [0], [0], [1], [0, 0, 1, 1], [], []>} : vector<16x64xf32>, vector<64x32xf32>, vector<16x32xf32> -> vector<16x32xf32>
    %167 = vector.broadcast %16 : vector<1x32xf32> to vector<16x32xf32>
    %168 = arith.addf %166, %167 : vector<16x32xf32>
    %169 = arith.addf %160, %168 : vector<16x32xf32>
    %cst_32 = arith.constant dense<0.000000e+00> : vector<16xf32>
    %170 = vector.multi_reduction <add>, %169, %cst_32 [1] : vector<16x32xf32> to vector<16xf32>
    %171 = vector.shape_cast %170 : vector<16xf32> to vector<16x1xf32>
    %cst_33 = arith.constant 3.200000e+01 : f32
    %172 = vector.broadcast %cst_33 : f32 to vector<16x1xf32>
    %173 = arith.divf %171, %172 : vector<16x1xf32>
    %174 = vector.broadcast %173 : vector<16x1xf32> to vector<16x32xf32>
    %175 = arith.subf %169, %174 : vector<16x32xf32>
    %176 = arith.mulf %175, %175 : vector<16x32xf32>
    %cst_34 = arith.constant dense<0.000000e+00> : vector<16xf32>
    %177 = vector.multi_reduction <add>, %176, %cst_34 [1] : vector<16x32xf32> to vector<16xf32>
    %178 = vector.shape_cast %177 : vector<16xf32> to vector<16x1xf32>
    %cst_35 = arith.constant 3.200000e+01 : f32
    %179 = vector.broadcast %cst_35 : f32 to vector<16x1xf32>
    %180 = arith.divf %178, %179 : vector<16x1xf32>
    %181 = vector.broadcast %173 : vector<16x1xf32> to vector<16x32xf32>
    %182 = arith.subf %169, %181 : vector<16x32xf32>
    %cst_36 = arith.constant 9.99999974E-6 : f32
    %183 = vector.broadcast %cst_36 : f32 to vector<16x1xf32>
    %184 = arith.addf %180, %183 : vector<16x1xf32>
    %185 = math.rsqrt %184 : vector<16x1xf32>
    %186 = vector.broadcast %185 : vector<16x1xf32> to vector<16x32xf32>
    %187 = arith.mulf %182, %186 : vector<16x32xf32>
    %188 = vector.broadcast %17 : vector<1x32xf32> to vector<16x32xf32>
    %189 = arith.mulf %187, %188 : vector<16x32xf32>
    %190 = vector.broadcast %18 : vector<1x32xf32> to vector<16x32xf32>
    %191 = arith.addf %189, %190 : vector<16x32xf32>
    %c0_37 = arith.constant 0 : index
    %c0_38 = arith.constant 0 : index
    %192 = vector.load %arg4[%c0_37, %c0_38] : memref<16x32xf32, #tpu.memory_space<vmem>>, vector<16x32xf32>
    tpu.vector_store %arg4[%c0_37, %c0_38], %191 {strides = array<i32>} : memref<16x32xf32, #tpu.memory_space<vmem>>, vector<16x32xf32>,
    return
  }
}

</mosaic_0001>

<bundles_post_ra>
// kernel: tpu_custom_call.1
= control target key start
LH: loop header
LB: loop body
LE: loop exit
PB: predicated region body
PF: predicated region fallthrough
CT: control target
= control target key end

     0   :  { %11 = vsyncpa [#allocation3], 0  ;;  %s1502_s0 = inlined_call_operand.vmem [shape: f32[16,32], index: 0, kind: input, shape index: {}]   ;;  %s1503_s1 = inlined_call_operand.vmem [shape: f32[32,224], index: 1, kind: input, shape index: {}]   ;;  %s1504_s2 = inlined_call_operand.vmem [shape: f32[64,32], index: 2, kind: input, shape index: {}]   ;;  %s1505_s3 = inlined_call_operand.vmem [shape: f32[11,128], index: 3, kind: input, shape index: {}]   ;;  %s1506_s4 = inlined_call_operand.hbm [shape: f32[16,32], index: 4, kind: output, shape index: {0}]   ;;  %s1507_s5 = inlined_call_operand.hbm [shape: f32[2,4,8,8], index: 5, kind: output, shape index: {1}]  }
   0x1   :  { %v1221_v0 = vld [vmem:[%s1503_s1 + $0x30] sm:$0xff]  ;;  %v1226_v1 = vld [vmem:[%s1503_s1 + $0x20] sm:$0xff] }
   0x2   :  { %61 = vmatpush.msra.mxu0 %v1221_v0  ;;  %v1057_v2 = vpack.i.bf16 %v1226_v1, %v1221_v0  ;;  %v1234_v3 = vld [vmem:[%s1503_s1 + $0x10] sm:$0xff]  ;;  %v1239_v4 = vld [vmem:[%s1503_s1] sm:$0xff] }
   0x3   :  { %v1062_v5 = vpack.i.bf16 %v1239_v4, %v1234_v3 }
   0x4   :  { %12 = vsyncpa [#allocation5], 0  ;;  %62 = vmatpush.msra.mxu0 %v1226_v1  ;;  %v1248_v6 = vld [vmem:[%s1502_s0] sm:$0xff]  ;;  %vm42_vm0 = vcmask 261120   ;;  %v1256_v7 = vld [vmem:[%s1502_s0 + $0x8] sm:$0xff]  ;;  %s1175_s7 = smov 104  }
   0x5   :  { %v1263_v8 = vld [vmem:[%s1505_s3] sm:$0xff]  ;;  %s1176_s8 = smov 120   ;;  %s1177_s0 = smov 112   ;;  %vm88_vm1 = vcmask 64512   ;;  %vm620_vm2 = vcmask 130048   ;;  %vm622_vm3 = vcmask 195584  }
   0x6   :  { %63 = vmatpush.msra.mxu0 %v1234_v3  ;;  %v41_v9 = vperm.slane %v1263_v8, 0  ;;  %s1178_s9 = smov 96   ;;  %s1179_s10 = smov 64  }
   0x7   :  { %s1180_s11 = smov 32   ;;  %s1181_s12 = smov 8  }
   0x8   :  { %64 = vmatpush.msra.mxu0 %v1239_v4  ;;  %s1182_s13 = smov 24   ;;  %s1183_s14 = smov 16  }
   0x9   :  { %995 = vmatmul.msk.f32.vlgmr.msra.gmra.mxu0 %vm42_vm0, %v1248_v6  ;;  %s978_s17 = sshll.u32 %s1507_s5, 4  ;;  %s1186_s18 = smov 128   ;;  %s979_s17 = int_to_ptr.hbm [resolvable:$true] %s978_s17 }
   0xa   :  { %s1187_s5 = smov [#allocation2]   ;;  %s965_s22 = sshll.u32 %s1506_s4, 4  ;;  %s966_s22 = int_to_ptr.hbm [resolvable:$true] %s965_s22 }
   0xb   :  { %s963_s19 = sshll.u32 %s1187_s5, 4  ;;  %s964_s19 = int_to_ptr.vmem [resolvable:$true] %s963_s19 }
  0x11   :  { %996 = vmatmul.msk.f32.gmra.mxu0 %vm42_vm0, %v1256_v7 }
  0x86   :  { %v66_v10 = vpop.f32.mrf.mxu0 }
  0x87   :  { %v1266_v11 = vadd.f32 %v66_v10, %v41_v9 }
  0x89   :  { %77 = vrot.lane.b32.xlu1 %v1266_v11, %s1175_s7  ;;  %73 = vrot.lane.b32.xlu0 %v1266_v11, %s1176_s8 }
  0x8e   :  { %v69_v12 = vpop.f32.mrf.mxu0 }
  0x8f   :  { %v1270_v13 = vadd.f32 %v69_v12, %v41_v9 }
  0x91   :  { %80 = vrot.lane.b32.xlu2 %v1270_v13, %s1176_s8  ;;  %84 = vrot.lane.b32.xlu1 %v1270_v13, %s1175_s7 }
  0x92   :  { %75 = vrot.lane.b32.xlu0 %v1266_v11, %s1177_s0 }
  0x99   :  { %82 = vrot.lane.b32.xlu2 %v1270_v13, %s1177_s0  ;;  %86 = vrot.lane.b32.xlu1 %v1266_v11, %s1178_s9 }
  0xa1   :  { %191 = vrot.lane.b32.xlu2 %v1270_v13, %s1178_s9 }
  0xeb   :  { %v1280_v14 = vpop.permute.xlu2 %80 }
  0xf3   :  { %v1282_v15 = vpop.permute.xlu2 %82 }
  0xfb   :  { %v192_v16 = vpop.permute.xlu2 %191  ;;  %v1284_v17 = vpop.permute.xlu1 %77 }
  0xfc   :  { %v1286_v18 = vpop.permute.xlu0 %73  ;;  %1005 = vmatpush.xpose.msk.msra.mxu2 %vm88_vm1, %v192_v16  ;;  %165 = vrot.lane.b32.xlu1 %v1284_v17, %s1178_s9 }
  0xfd   :  { %113 = vrot.lane.b32.xlu0 %v1286_v18, %s1178_s9 }
  0xff   :  { %1006 = vmatmul.msk.f32.vlgmr.msra.gmra.mxu2 %vm88_vm1, %v1270_v13 }
 0x103   :  { %v85_v19 = vpop.permute.xlu1 %84 }
 0x104   :  { %v76_v20 = vpop.permute.xlu0 %75  ;;  %243 = vrot.lane.b32.xlu1 %v1282_v15, %s1178_s9  ;;  %269 = vrot.lane.b32.xlu2 %v85_v19, %s1178_s9 }
 0x105   :  { %139 = vrot.lane.b32.xlu0 %v76_v20, %s1178_s9  ;;  %v1047_v52 = vpack.i.bf16 %v85_v19, %v76_v20 }
 0x10b   :  { %v87_v21 = vpop.permute.xlu1 %86 }
 0x10c   :  { %997 = vmatpush.xpose.msk.msra.mxu1 %vm88_vm1, %v87_v21 }
 0x10d   :  { %217 = vrot.lane.b32.xlu0 %v1280_v14, %s1178_s9 }
 0x10f   :  { %998 = vmatmul.msk.f32.vlgmr.msra.gmra.mxu1 %vm88_vm1, %v1266_v11 }
 0x15e   :  { %v270_v22 = vpop.permute.xlu2 %269 }
 0x15f   :  { %1011 = vmatpush.xpose.msk.msrb.mxu2 %vm88_vm1, %v270_v22 }
 0x162   :  { %1012 = vmatmul.msk.f32.vlgmr.msrb.gmra.mxu2 %vm88_vm1, %v85_v19 }
 0x16e   :  { %v166_v23 = vpop.permute.xlu1 %165 }
 0x16f   :  { %v114_v24 = vpop.permute.xlu0 %113  ;;  %1003 = vmatpush.xpose.msk.msrb.mxu1 %vm88_vm1, %v166_v23 }
 0x170   :  { %999 = vmatpush.xpose.msk.msra.mxu3 %vm88_vm1, %v114_v24 }
 0x172   :  { %1004 = vmatmul.msk.f32.vlgmr.msrb.gmra.mxu1 %vm88_vm1, %v1284_v17 }
 0x173   :  { %1000 = vmatmul.msk.f32.vlgmr.msra.gmra.mxu3 %vm88_vm1, %v1286_v18 }
 0x176   :  { %v244_v25 = vpop.permute.xlu1 %243 }
 0x177   :  { %v140_v26 = vpop.permute.xlu0 %139  ;;  %1009 = vmatpush.xpose.msk.msra.mxu1 %vm88_vm1, %v244_v25 }
 0x178   :  { %1001 = vmatpush.xpose.msk.msrb.mxu3 %vm88_vm1, %v140_v26 }
 0x17a   :  { %1010 = vmatmul.msk.f32.vlgmr.msra.gmra.mxu1 %vm88_vm1, %v1282_v15 }
 0x17b   :  { %1002 = vmatmul.msk.f32.vlgmr.msrb.gmra.mxu3 %vm88_vm1, %v76_v20 }
 0x17f   :  { %v218_v27 = vpop.permute.xlu0 %217 }
 0x180   :  { %1007 = vmatpush.xpose.msk.msra.mxu3 %vm88_vm1, %v218_v27 }
 0x182   :  { %v214_v32 = vpop.f32.mrf.mxu2 }
 0x183   :  { %1008 = vmatmul.msk.f32.vlgmr.msra.gmra.mxu3 %vm88_vm1, %v1280_v14  ;;  %v1321_v33 = vmul.f32 0.35355338, %v214_v32 }
 0x185   :  { %v315_v38 = vsel %vm88_vm1, %v1321_v33, -inf }
 0x18c   :  { %v110_v28 = vpop.f32.mrf.mxu1 }
 0x18d   :  { %v1329_v47 = vmul.f32 0.35355338, %v110_v28 }
 0x18f   :  { %v303_v50 = vsel %vm88_vm1, %v1329_v47, -inf }
 0x1e5   :  { %v292_v39 = vpop.f32.mrf.mxu2 }
 0x1e6   :  { %v302_v41 = vmul.f32 0.35355338, %v292_v39  ;;  %v1052_v39 = vpack.i.bf16 %v1282_v15, %v1280_v14 }
 0x1e8   :  { %v324_v46 = vsel %vm88_vm1, %v302_v41, -inf }
 0x1ef   :  { %v188_v29 = vpop.f32.mrf.mxu1 }
 0x1f0   :  { %v298_v30 = vmul.f32 0.35355338, %v188_v29 }
 0x1f2   :  { %v312_v31 = vsel %vm88_vm1, %v298_v30, -inf }
 0x1f3   :  { %313 = vmax.xlane.f32.xlu2 %v312_v31 }
 0x1f6   :  { %v136_v34 = vpop.f32.mrf.mxu3 }
 0x1f7   :  { %v296_v35 = vmul.f32 0.35355338, %v136_v34  ;;  %v266_v37 = vpop.f32.mrf.mxu1 }
 0x1f8   :  { %v301_v40 = vmul.f32 0.35355338, %v266_v37 }
 0x1f9   :  { %v306_v36 = vsel %vm88_vm1, %v296_v35, -inf }
 0x1fa   :  { %307 = vmax.xlane.f32.xlu0 %v306_v36  ;;  %v321_v44 = vsel %vm88_vm1, %v301_v40, -inf }
 0x1fb   :  { %316 = vmax.xlane.f32.xlu2 %v315_v38  ;;  %v1042_v38 = vpack.i.bf16 %v1286_v18, %v1284_v17 }
 0x1fe   :  { %v162_v42 = vpop.f32.mrf.mxu3 }
 0x1ff   :  { %v297_v43 = vmul.f32 0.35355338, %v162_v42 }
 0x201   :  { %v309_v45 = vsel %vm88_vm1, %v297_v43, -inf }
 0x202   :  { %322 = vmax.xlane.f32.xlu0 %v321_v44  ;;  %310 = vmax.xlane.f32.xlu1 %v309_v45 }
 0x203   :  { %325 = vmax.xlane.f32.xlu2 %v324_v46 }
 0x206   :  { %v240_v48 = vpop.f32.mrf.mxu3 }
 0x207   :  { %v300_v49 = vmul.f32 0.35355338, %v240_v48 }
 0x209   :  { %v318_v51 = vsel %vm88_vm1, %v300_v49, -inf }
 0x20a   :  { %304 = vmax.xlane.f32.xlu1 %v303_v50 }
 0x20b   :  { %319 = vmax.xlane.f32.xlu2 %v318_v51 }
 0x223   :  { %1048 = vrot.lane.b32.xlu2 %v1047_v52, %s1179_s10 }
 0x266   :  { %v314_v53 = vpop.xlane.xlu2 %313 }
 0x267   :  { %v330_v54 = vsub.f32 %v298_v30, %v314_v53 }
 0x269   :  { %v341_v55 = vmul.f32 1.442695, %v330_v54 }
 0x26b   :  { %1077 = vpow2.f32 %v341_v55 }
 0x26d   :  { %v308_v56 = vpop.xlane.xlu0 %307 }
 0x26e   :  { %v328_v57 = vsub.f32 %v296_v35, %v308_v56  ;;  %v317_v58 = vpop.xlane.xlu2 %316 }
 0x26f   :  { %v331_v17 = vsub.f32 %v1321_v33, %v317_v58 }
 0x270   :  { %v337_v59 = vmul.f32 1.442695, %v328_v57 }
 0x271   :  { %v1078_v60 = vpop.eup %1077 }
 0x272   :  { %1079 = vpow2.f32 %v337_v59  ;;  %v360_v61 = vsel %vm88_vm1, %v1078_v60, 0.0 }
 0x273   :  { %361 = vadd.xlane.f32.xlu0 %v360_v61 }
 0x275   :  { %v311_v62 = vpop.xlane.xlu1 %310  ;;  %v323_v63 = vpop.xlane.xlu0 %322 }
 0x276   :  { %v329_v9 = vsub.f32 %v297_v43, %v311_v62  ;;  %v333_v10 = vsub.f32 %v301_v40, %v323_v63  ;;  %v326_v12 = vpop.xlane.xlu2 %325  ;;  %v343_v43 = vmul.f32 1.442695, %v331_v17 }
 0x277   :  { %v334_v21 = vsub.f32 %v302_v41, %v326_v12 }
 0x278   :  { %v1080_v16 = vpop.eup %1079  ;;  %v339_v19 = vmul.f32 1.442695, %v329_v9  ;;  %v347_v20 = vmul.f32 1.442695, %v333_v10 }
 0x279   :  { %v354_v22 = vsel %vm88_vm1, %v1080_v16, 0.0  ;;  %v349_v23 = vmul.f32 1.442695, %v334_v21 }
 0x27a   :  { %1081 = vpow2.f32 %v339_v19  ;;  %355 = vadd.xlane.f32.xlu1 %v354_v22 }
 0x27b   :  { %1083 = vpow2.f32 %v347_v20 }
 0x27c   :  { %1085 = vpow2.f32 %v349_v23 }
 0x27d   :  { %v305_v40 = vpop.xlane.xlu1 %304 }
 0x27e   :  { %v320_v24 = vpop.xlane.xlu2 %319  ;;  %v327_v41 = vsub.f32 %v1329_v47, %v305_v40 }
 0x27f   :  { %v332_v25 = vsub.f32 %v300_v49, %v320_v24 }
 0x280   :  { %v1082_v26 = vpop.eup %1081  ;;  %v335_v42 = vmul.f32 1.442695, %v327_v41 }
 0x281   :  { %v1084_v27 = vpop.eup %1083  ;;  %v345_v28 = vmul.f32 1.442695, %v332_v25  ;;  %v357_v29 = vsel %vm88_vm1, %v1082_v26, 0.0 }
 0x282   :  { %358 = vadd.xlane.f32.xlu2 %v357_v29  ;;  %v369_v30 = vsel %vm88_vm1, %v1084_v27, 0.0  ;;  %v1086_v32 = vpop.eup %1085 }
 0x283   :  { %1087 = vpow2.f32 %v345_v28  ;;  %370 = vadd.xlane.f32.xlu0 %v369_v30  ;;  %v372_v36 = vsel %vm88_vm1, %v1086_v32, 0.0 }
 0x284   :  { %1089 = vpow2.f32 %v335_v42 }
 0x285   :  { %1091 = vpow2.f32 %v343_v43 }
 0x286   :  { %v1339_v31 = vpop.permute.xlu2 %1048 }
 0x287   :  { %v1050_v34 = vunpack.i.l.bf16 %v1339_v31  ;;  %v1051_v4 = vunpack.i.h.bf16 %v1339_v31 }
 0x289   :  { %v1088_v35 = vpop.eup %1087  ;;  %472 = vmatpush.msrb.mxu1 %v1050_v34 }
 0x28a   :  { %v366_v37 = vsel %vm88_vm1, %v1088_v35, 0.0  ;;  %v1356_v18 = vpop.eup %1089 }
 0x28b   :  { %373 = vadd.xlane.f32.xlu0 %v372_v36  ;;  %367 = vadd.xlane.f32.xlu2 %v366_v37  ;;  %v351_v14 = vsel %vm88_vm1, %v1356_v18, 0.0  ;;  %v1360_v15 = vpop.eup %1091 }
 0x293   :  { %1043 = vrot.lane.b32.xlu1 %v1042_v38, %s1179_s10 }
 0x29f   :  { %1053 = vrot.lane.b32.xlu0 %v1052_v39, %s1179_s10 }
 0x2a3   :  { %399 = vrot.lane.b32.xlu2 %v1266_v11, %s1179_s10  ;;  %v363_v11 = vsel %vm88_vm1, %v1360_v15, 0.0 }
 0x2ab   :  { %503 = vrot.lane.b32.xlu2 %v1270_v13, %s1179_s10 }
 0x2b3   :  { %1058 = vrot.lane.b32.xlu2 %v1057_v2, %s1180_s11 }
 0x2bd   :  { %352 = vadd.xlane.f32.xlu1 %v351_v14 }
 0x2c9   :  { %364 = vadd.xlane.f32.xlu0 %v363_v11 }
 0x2d6   :  { %1063 = vrot.lane.b32.xlu1 %v1062_v5, %s1180_s11 }
 0x2e6   :  { %v362_v44 = vpop.xlane.xlu0 %361 }
 0x2e7   :  { %1093 = vrcp.f32 %v362_v44 }
 0x2ed   :  { %v1094_v13 = vpop.eup %1093  ;;  %v356_v45 = vpop.xlane.xlu1 %355 }
 0x2ee   :  { %v386_v46 = vmul.f32 %v1094_v13, %v1078_v60  ;;  %1095 = vrcp.f32 %v356_v45 }
 0x2f0   :  { %394 = vst.msk [vmem:[#allocation4 + $0x18] sm:$0xff] %vm88_vm1, %v386_v46 }
 0x2f4   :  { %v1096_v33 = vpop.eup %1095 }
 0x2f5   :  { %v359_v47 = vpop.xlane.xlu2 %358  ;;  %v384_v48 = vmul.f32 %v1096_v33, %v1080_v16 }
 0x2f6   :  { %1097 = vrcp.f32 %v359_v47  ;;  %v371_v49 = vpop.xlane.xlu0 %370 }
 0x2f7   :  { %1099 = vrcp.f32 %v371_v49  ;;  %392 = vst.msk [vmem:[#allocation4 + $0x8] sm:$0xff] %vm88_vm1, %v384_v48  ;;  %v1184_v49 = vmov 32.0  }
 0x2fc   :  { %v1098_v50 = vpop.eup %1097 }
 0x2fd   :  { %v1100_v51 = vpop.eup %1099  ;;  %v385_v52 = vmul.f32 %v1098_v50, %v1082_v26 }
 0x2fe   :  { %v389_v53 = vmul.f32 %v1100_v51, %v1084_v27  ;;  %v374_v54 = vpop.xlane.xlu0 %373  ;;  %v368_v55 = vpop.xlane.xlu2 %367 }
 0x2ff   :  { %393 = vst.msk [vmem:[#allocation4 + $0x10] sm:$0xff] %vm88_vm1, %v385_v52  ;;  %1101 = vrcp.f32 %v374_v54  ;;  %1015 = vmatmul.msk.f32.vlgmr.msrb.gmra.mxu1 %vm88_vm1, %v385_v52 }
 0x300   :  { %397 = vst.msk [vmem:[#allocation4 + $0x30] sm:$0xff] %vm88_vm1, %v389_v53  ;;  %1103 = vrcp.f32 %v368_v55 }
 0x305   :  { %v1102_v56 = vpop.eup %1101  ;;  %v1044_v57 = vpop.permute.xlu1 %1043 }
 0x306   :  { %v1104_v58 = vpop.eup %1103  ;;  %v390_v0 = vmul.f32 %v1102_v56, %v1086_v32  ;;  %v1045_v1 = vunpack.i.l.bf16 %v1044_v57  ;;  %v400_v2 = vpop.permute.xlu2 %399  ;;  %v1046_v59 = vunpack.i.h.bf16 %v1044_v57 }
 0x307   :  { %v388_v3 = vmul.f32 %v1104_v58, %v1088_v35  ;;  %420 = vmatpush.msrb.mxu3 %v400_v2 }
 0x308   :  { %398 = vst.msk [vmem:[#allocation4 + $0x38] sm:$0xff] %vm88_vm1, %v390_v0  ;;  %446 = vmatpush.msrb.mxu0 %v1046_v59  ;;  %498 = vmatpush.msra.mxu2 %v1045_v1 }
 0x309   :  { %396 = vst.msk [vmem:[#allocation4 + $0x28] sm:$0xff] %vm88_vm1, %v388_v3  ;;  %1014 = vmatmul.msk.f32.vlgmr.msrb.gmra.mxu0 %vm88_vm1, %v384_v48  ;;  %1016 = vmatmul.msk.f32.vlgmr.msra.gmra.mxu2 %vm88_vm1, %v386_v46 }
 0x30a   :  { %602 = vmatpush.msrb.mxu2 %v1051_v4  ;;  %v30_v4 = vld [vmem:[%s1503_s1 + $0x38] sm:$0xff] }
 0x30e   :  { %v504_v5 = vpop.permute.xlu2 %503 }
 0x30f   :  { %524 = vmatpush.msra.mxu3 %v504_v5  ;;  %v28_v5 = vld [vmem:[%s1503_s1 + $0x28] sm:$0xff] }
 0x311   :  { %v1054_v60 = vpop.permute.xlu0 %1053  ;;  %1020 = vmatmul.msk.f32.vlgmr.msrb.gmra.mxu2 %vm88_vm1, %v390_v0 }
 0x312   :  { %v1056_v61 = vunpack.i.h.bf16 %v1054_v60  ;;  %v1055_v62 = vunpack.i.l.bf16 %v1054_v60  ;;  %v1415_v60 = vld [vmem:[%s1503_s1 + $0x18] sm:$0xff] }
 0x314   :  { %550 = vmatpush.msra.mxu0 %v1055_v62  ;;  %576 = vmatpush.msra.mxu1 %v1056_v61  ;;  %v1421_v61 = vld [vmem:[%s1503_s1 + $0x8] sm:$0xff]  ;;  %v1067_v62 = vpack.i.bf16 %v28_v5, %v30_v4 }
 0x315   :  { %1018 = vmatmul.msk.f32.vlgmr.msra.gmra.mxu0 %vm88_vm1, %v388_v3  ;;  %1019 = vmatmul.msk.f32.vlgmr.msra.gmra.mxu1 %vm88_vm1, %v389_v53 }
 0x316   :  { %v1059_v26 = vpop.permute.xlu2 %1058  ;;  %763 = vmatpush.msrb.mxu0 %v30_v4 }
 0x317   :  { %v1061_v27 = vunpack.i.h.bf16 %v1059_v26  ;;  %v1060_v28 = vunpack.i.l.bf16 %v1059_v26 }
 0x318   :  { %764 = vmatpush.msrb.mxu0 %v28_v5 }
 0x31a   :  { %765 = vmatpush.msrb.mxu0 %v1415_v60 }
 0x31c   :  { %766 = vmatpush.msrb.mxu0 %v1421_v61 }
 0x330   :  { %v353_v63 = vpop.xlane.xlu1 %352 }
 0x331   :  { %1105 = vrcp.f32 %v353_v63  ;;  %v1072_v63 = vpack.i.bf16 %v1421_v61, %v1415_v60 }
 0x337   :  { %v1106_v9 = vpop.eup %1105 }
 0x338   :  { %v383_v10 = vmul.f32 %v1106_v9, %v1356_v18 }
 0x33a   :  { %391 = vst.msk [vmem:[#allocation4] sm:$0xff] %vm88_vm1, %v383_v10  ;;  %1013 = vmatmul.msk.f32.vlgmr.msrb.gmra.mxu3 %vm88_vm1, %v383_v10 }
 0x33b   :  { %674 = vmatpush.msrb.mxu3 %v1060_v28 }
 0x33c   :  { %v365_v12 = vpop.xlane.xlu0 %364 }
 0x33d   :  { %1107 = vrcp.f32 %v365_v12  ;;  %675 = vmatpush.msrb.mxu3 %v1061_v27 }
 0x33e   :  { %1109 = vrcp.f32 %v1184_v49 }
 0x343   :  { %v1108_v16 = vpop.eup %1107 }
 0x344   :  { %v387_v19 = vmul.f32 %v1108_v16, %v1360_v15  ;;  %v639_v15 = vperm.slane %v1263_v8, 1  ;;  %v1110_v50 = vpop.eup %1109 }
 0x345   :  { %v694_v51 = vmul.f32 32.0, %v1110_v50  ;;  %vm698_vm4 = vweird.f32 %v1110_v50 }
 0x346   :  { %395 = vst.msk [vmem:[#allocation4 + $0x20] sm:$0xff] %vm88_vm1, %v387_v19  ;;  %1017 = vmatmul.msk.f32.vlgmr.msra.gmra.mxu3 %vm88_vm1, %v387_v19 }
 0x347   :  { %v695_v52 = vsub.f32 1.0, %v694_v51 }
 0x348   :  { %v1064_v29 = vpop.permute.xlu1 %1063 }
 0x349   :  { %v1066_v30 = vunpack.i.h.bf16 %v1064_v29  ;;  %v1065_v31 = vunpack.i.l.bf16 %v1064_v29  ;;  %v696_v53 = vmul.f32 %v1110_v50, %v695_v52  ;;  %v738_v29 = vperm.slane %v1263_v8, 2 }
 0x34b   :  { %676 = vmatpush.msrb.mxu3 %v1065_v31  ;;  %v697_v54 = vadd.f32 %v1110_v50, %v696_v53 }
 0x34d   :  { %677 = vmatpush.msrb.mxu3 %v1066_v30  ;;  %v1400_v55 = vsel %vm698_vm4, %v1110_v50, %v697_v54 }
 0x37c   :  { %v474_v22 = vpop.f32.mrf.mxu1 }
 0x386   :  { %v448_v20 = vpop.f32.mrf.mxu0 }
 0x387   :  { %608 = vrot.lane.b32.xlu2 %v448_v20, %s1181_s12 }
 0x38c   :  { %v500_v21 = vpop.f32.mrf.mxu2 }
 0x38d   :  { %616 = vrot.lane.b32.xlu0 %v500_v21, %s1182_s13 }
 0x38f   :  { %612 = vrot.lane.b32.xlu2 %v474_v22, %s1183_s14 }
 0x392   :  { %v552_v24 = vpop.f32.mrf.mxu0  ;;  %v578_v25 = vpop.f32.mrf.mxu1 }
 0x394   :  { %v604_v23 = vpop.f32.mrf.mxu2 }
 0x395   :  { %633 = vrot.lane.b32.xlu1 %v604_v23, %s1182_s13 }
 0x397   :  { %625 = vrot.lane.b32.xlu2 %v552_v24, %s1181_s12 }
 0x39f   :  { %629 = vrot.lane.b32.xlu2 %v578_v25, %s1183_s14 }
 0x3bd   :  { %v422_v36 = vpop.f32.mrf.mxu3 }
 0x3c9   :  { %v526_v42 = vpop.f32.mrf.mxu3 }
 0x3e1   :  { %v609_v32 = vpop.permute.xlu2 %608 }
 0x3e2   :  { %v619_v37 = vsel %vm88_vm1, %v422_v36, %v609_v32 }
 0x3e9   :  { %v613_v34 = vpop.permute.xlu2 %612 }
 0x3ea   :  { %v621_v38 = vsel %vm620_vm2, %v619_v37, %v613_v34  ;;  %v741_v34 = vperm.slane %v1263_v8, 3 }
 0x3f1   :  { %v626_v35 = vpop.permute.xlu2 %625 }
 0x3f2   :  { %v636_v17 = vsel %vm88_vm1, %v526_v42, %v626_v35 }
 0x3f9   :  { %v630_v41 = vpop.permute.xlu2 %629 }
 0x3fa   :  { %v637_v18 = vsel %vm620_vm2, %v636_v17, %v630_v41  ;;  %vm875_vm2 = vcmask 523264  }
 0x3ff   :  { %v617_v39 = vpop.permute.xlu0 %616 }
 0x400   :  { %v623_v40 = vsel %vm622_vm3, %v621_v38, %v617_v39 }
 0x401   :  { %1021 = vmatmul.msk.f32.vlgmr.msrb.gmra.mxu3 %vm42_vm0, %v623_v40 }
 0x407   :  { %v634_v43 = vpop.permute.xlu1 %633 }
 0x408   :  { %v638_v14 = vsel %vm622_vm3, %v637_v18, %v634_v43  ;;  %v744_v18 = vperm.slane %v1263_v8, 4 }
 0x409   :  { %1022 = vmatmul.msk.f32.gmra.mxu3 %vm42_vm0, %v638_v14 }
 0x484   :  { %v679_v11 = vpop.f32.mrf.mxu3 }
 0x485   :  { %v680_v44 = vadd.f32 %v679_v11, %v639_v15 }
 0x487   :  { %v685_v13 = vadd.f32 %v680_v44, %v1248_v6 }
 0x489   :  { %v687_v45 = vsel %vm42_vm0, %v685_v13, 0.0 }
 0x48a   :  { %688 = vadd.xlane.f32.xlu2 %v687_v45 }
 0x48c   :  { %v682_v46 = vpop.f32.mrf.mxu3 }
 0x48d   :  { %v683_v33 = vadd.f32 %v682_v46, %v639_v15 }
 0x48f   :  { %v686_v47 = vadd.f32 %v683_v33, %v1256_v7 }
 0x491   :  { %v690_v48 = vsel %vm42_vm0, %v686_v47, 0.0 }
 0x492   :  { %691 = vadd.xlane.f32.xlu0 %v690_v48 }
 0x4fd   :  { %v689_v6 = vpop.xlane.xlu2 %688 }
 0x4fe   :  { %v700_v56 = vmul.f32 %v1400_v55, %v689_v6 }
 0x500   :  { %v702_v57 = vsub.f32 %v685_v13, %v700_v56 }
 0x502   :  { %v704_v58 = vmul.f32 %v702_v57, %v702_v57 }
 0x504   :  { %v706_v7 = vsel %vm42_vm0, %v704_v58, 0.0 }
 0x505   :  { %v692_v0 = vpop.xlane.xlu0 %691  ;;  %707 = vadd.xlane.f32.xlu1 %v706_v7 }
 0x506   :  { %v701_v1 = vmul.f32 %v1400_v55, %v692_v0 }
 0x508   :  { %v703_v2 = vsub.f32 %v686_v47, %v701_v1 }
 0x50a   :  { %v705_v59 = vmul.f32 %v703_v2, %v703_v2 }
 0x50c   :  { %v709_v3 = vsel %vm42_vm0, %v705_v59, 0.0  ;;  %v37_v59 = vld [vmem:[%s1504_s2 + $0x30] sm:$0xff] }
 0x50d   :  { %710 = vadd.xlane.f32.xlu2 %v709_v3  ;;  %v36_v3 = vld [vmem:[%s1504_s2 + $0x28] sm:$0xff] }
 0x578   :  { %v708_v9 = vpop.xlane.xlu1 %707 }
 0x579   :  { %v712_v10 = vmul.f32 %v708_v9, %v1400_v55 }
 0x57b   :  { %v714_v12 = vadd.f32 1e-05, %v712_v10 }
 0x57d   :  { %1111 = vrsqrt.f32 %v714_v12  ;;  %vm722_vm6 = vweird.f32 %v714_v12 }
 0x580   :  { %v711_v16 = vpop.xlane.xlu2 %710 }
 0x581   :  { %v713_v19 = vmul.f32 %v711_v16, %v1400_v55 }
 0x583   :  { %v1112_v20 = vpop.eup %1111  ;;  %v715_v21 = vadd.f32 1e-05, %v713_v19 }
 0x584   :  { %v717_v22 = vmul.f32 %v1112_v20, %v714_v12  ;;  %vm723_vm5 = vweird.f32 %v1112_v20  ;;  %v34_v12 = vld [vmem:[%s1504_s2 + $0x18] sm:$0xff] }
 0x585   :  { %1113 = vrsqrt.f32 %v715_v21  ;;  %vm724_vm7 = vmor %vm722_vm6, %vm723_vm5  ;;  %vm732_vm9 = vweird.f32 %v715_v21 }
 0x586   :  { %v718_v23 = vmul.f32 %v1112_v20, %v717_v22 }
 0x588   :  { %v719_v24 = vmul.f32 0.5, %v718_v23 }
 0x58a   :  { %v720_v25 = vsub.f32 1.5, %v719_v24 }
 0x58b   :  { %v1114_v26 = vpop.eup %1113 }
 0x58c   :  { %v721_v27 = vmul.f32 %v1112_v20, %v720_v25  ;;  %v727_v28 = vmul.f32 %v1114_v26, %v715_v21  ;;  %vm733_vm8 = vweird.f32 %v1114_v26  ;;  %v820_v25 = vperm.slane %v1263_v8, 5 }
 0x58d   :  { %vm734_vm10 = vmor %vm732_vm9, %vm733_vm8 }
 0x58e   :  { %v725_v30 = vsel %vm724_vm7, %v1112_v20, %v721_v27  ;;  %v728_v31 = vmul.f32 %v1114_v26, %v727_v28 }
 0x58f   :  { %v736_v32 = vmul.f32 %v725_v30, %v702_v57 }
 0x590   :  { %v729_v35 = vmul.f32 0.5, %v728_v31 }
 0x591   :  { %v739_v36 = vmul.f32 %v738_v29, %v736_v32 }
 0x592   :  { %v730_v37 = vsub.f32 1.5, %v729_v35 }
 0x593   :  { %v742_v38 = vadd.f32 %v741_v34, %v739_v36 }
 0x594   :  { %v731_v39 = vmul.f32 %v1114_v26, %v730_v37 }
 0x595   :  { %1023 = vmatmul.msk.f32.vlgmr.msrb.gmra.mxu0 %vm42_vm0, %v742_v38 }
 0x596   :  { %v735_v40 = vsel %vm734_vm10, %v1114_v26, %v731_v39 }
 0x597   :  { %v737_v41 = vmul.f32 %v735_v40, %v703_v2  ;;  %v38_v2 = vld [vmem:[%s1504_s2 + $0x38] sm:$0xff]  ;;  %v33_v40 = vld [vmem:[%s1504_s2 + $0x10] sm:$0xff] }
 0x598   :  { %890 = vmatpush.msra.mxu2 %v38_v2 }
 0x599   :  { %v740_v42 = vmul.f32 %v738_v29, %v737_v41  ;;  %v823_v29 = vperm.slane %v1263_v8, 6  ;;  %v32_v41 = vld [vmem:[%s1504_s2 + $0x8] sm:$0xff] }
 0x59a   :  { %891 = vmatpush.msra.mxu2 %v37_v59 }
 0x59b   :  { %v743_v17 = vadd.f32 %v741_v34, %v740_v42  ;;  %v31_v42 = vld [vmem:[%s1504_s2] sm:$0xff] }
 0x59c   :  { %892 = vmatpush.msra.mxu2 %v36_v3 }
 0x59d   :  { %1024 = vmatmul.msk.f32.gmra.mxu0 %vm42_vm0, %v743_v17  ;;  %v826_v17 = vperm.slane %v1263_v8, 7 }
 0x612   :  { %v768_v43 = vpop.f32.mrf.mxu0 }
 0x613   :  { %v769_v14 = vadd.f32 %v768_v43, %v744_v18 }
 0x615   :  { %v774_v15 = vmax.f32 %v769_v14, 0.0 }
 0x617   :  { %v776_v11 = vsel %vm42_vm0, %v774_v15, 0.0 }
 0x618   :  { %777 = vadd.xlane.f32.xlu0 %v776_v11 }
 0x61a   :  { %v771_v44 = vpop.f32.mrf.mxu0 }
 0x61b   :  { %v772_v13 = vadd.f32 %v771_v44, %v744_v18 }
 0x61d   :  { %v775_v45 = vmax.f32 %v772_v13, 0.0  ;;  %v1475_v13 = vld [vmem:[%s1505_s3 + $0x8] sm:$0x7] }
 0x61f   :  { %v779_v46 = vsel %vm42_vm0, %v775_v45, 0.0 }
 0x620   :  { %780 = vadd.xlane.f32.xlu1 %v779_v46 }
 0x639   :  { %1068 = vrot.lane.b32.xlu1 %v1067_v62, %s1178_s9 }
 0x68b   :  { %v778_v33 = vpop.xlane.xlu0 %777 }
 0x68c   :  { %v782_v47 = vmul.f32 %v778_v33, %v1400_v55 }
 0x68e   :  { %v784_v48 = vsub.f32 %v774_v15, %v782_v47 }
 0x690   :  { %v786_v49 = vmul.f32 %v784_v48, %v784_v48 }
 0x692   :  { %v788_v50 = vsel %vm42_vm0, %v786_v49, 0.0 }
 0x693   :  { %789 = vadd.xlane.f32.xlu2 %v788_v50  ;;  %v781_v51 = vpop.xlane.xlu1 %780 }
 0x694   :  { %v783_v52 = vmul.f32 %v781_v51, %v1400_v55 }
 0x696   :  { %v785_v53 = vsub.f32 %v775_v45, %v783_v52  ;;  %v874_v45 = vperm.slane %v1475_v13, 0 }
 0x698   :  { %v787_v54 = vmul.f32 %v785_v53, %v785_v53 }
 0x69a   :  { %v791_v6 = vsel %vm42_vm0, %v787_v54, 0.0 }
 0x69b   :  { %792 = vadd.xlane.f32.xlu0 %v791_v6 }
 0x6ab   :  { %1073 = vrot.lane.b32.xlu2 %v1072_v63, %s1178_s9  ;;  %v1069_v56 = vpop.permute.xlu1 %1068  ;;  %v35_v63 = vld [vmem:[%s1504_s2 + $0x20] sm:$0xff]  ;;  %s1185_s2 = smov [#allocation4]  }
 0x6ac   :  { %v1070_v57 = vunpack.i.l.bf16 %v1069_v56  ;;  %v1071_v58 = vunpack.i.h.bf16 %v1069_v56  ;;  %893 = vmatpush.msra.mxu2 %v35_v63  ;;  %s976_s3 = sshll.u32 %s1185_s2, 4  ;;  %s977_s3 = int_to_ptr.vmem [resolvable:$true] %s976_s3 }
 0x6ad   :  { %984 = dma.vmem_to_hbm [thread:$0]  %s977_s3, 1024, %s979_s17, [#allocation5], %s1186_s18, %s1186_s18, %s1181_s12  }
 0x6ae   :  { %861 = vmatpush.msrb.mxu1 %v1070_v57  ;;  %894 = vmatpush.msra.mxu2 %v34_v12 }
 0x6b0   :  { %862 = vmatpush.msrb.mxu1 %v1071_v58  ;;  %895 = vmatpush.msra.mxu2 %v33_v40 }
 0x6b2   :  { %896 = vmatpush.msra.mxu2 %v32_v41 }
 0x6b4   :  { %897 = vmatpush.msra.mxu2 %v31_v42 }
 0x706   :  { %v790_v7 = vpop.xlane.xlu2 %789 }
 0x707   :  { %v794_v0 = vmul.f32 %v790_v7, %v1400_v55 }
 0x709   :  { %v796_v1 = vadd.f32 1e-05, %v794_v0 }
 0x70b   :  { %1115 = vrsqrt.f32 %v796_v1  ;;  %vm804_vm12 = vweird.f32 %v796_v1 }
 0x70e   :  { %v793_v4 = vpop.xlane.xlu0 %792  ;;  %v1074_v5 = vpop.permute.xlu2 %1073 }
 0x70f   :  { %v795_v60 = vmul.f32 %v793_v4, %v1400_v55  ;;  %v1076_v61 = vunpack.i.h.bf16 %v1074_v5  ;;  %v1075_v62 = vunpack.i.l.bf16 %v1074_v5 }
 0x711   :  { %v1116_v9 = vpop.eup %1115  ;;  %v797_v10 = vadd.f32 1e-05, %v795_v60  ;;  %863 = vmatpush.msrb.mxu1 %v1075_v62 }
 0x712   :  { %v799_v16 = vmul.f32 %v1116_v9, %v796_v1  ;;  %vm805_vm11 = vweird.f32 %v1116_v9 }
 0x713   :  { %1117 = vrsqrt.f32 %v797_v10  ;;  %864 = vmatpush.msrb.mxu1 %v1076_v61  ;;  %vm806_vm13 = vmor %vm804_vm12, %vm805_vm11  ;;  %vm814_vm15 = vweird.f32 %v797_v10 }
 0x714   :  { %v800_v19 = vmul.f32 %v1116_v9, %v799_v16 }
 0x716   :  { %v801_v20 = vmul.f32 0.5, %v800_v19 }
 0x718   :  { %v802_v21 = vsub.f32 1.5, %v801_v20  ;;  %v951_v20 = vperm.slane %v1475_v13, 1 }
 0x719   :  { %v1118_v22 = vpop.eup %1117 }
 0x71a   :  { %v803_v23 = vmul.f32 %v1116_v9, %v802_v21  ;;  %v809_v24 = vmul.f32 %v1118_v22, %v797_v10  ;;  %vm815_vm14 = vweird.f32 %v1118_v22 }
 0x71b   :  { %vm816_vm1 = vmor %vm814_vm15, %vm815_vm14 }
 0x71c   :  { %v807_v26 = vsel %vm806_vm13, %v1116_v9, %v803_v23  ;;  %v810_v27 = vmul.f32 %v1118_v22, %v809_v24  ;;  %v954_v23 = vperm.slane %v1475_v13, 2 }
 0x71d   :  { %v818_v28 = vmul.f32 %v807_v26, %v784_v48 }
 0x71e   :  { %v811_v30 = vmul.f32 0.5, %v810_v27 }
 0x71f   :  { %v821_v31 = vmul.f32 %v820_v25, %v818_v28 }
 0x720   :  { %v812_v32 = vsub.f32 1.5, %v811_v30 }
 0x721   :  { %v824_v34 = vadd.f32 %v823_v29, %v821_v31 }
 0x722   :  { %v813_v35 = vmul.f32 %v1118_v22, %v812_v32 }
 0x723   :  { %1025 = vmatmul.msk.f32.vlgmr.msrb.gmra.mxu1 %vm42_vm0, %v824_v34 }
 0x724   :  { %v817_v36 = vsel %vm816_vm1, %v1118_v22, %v813_v35 }
 0x725   :  { %v819_v37 = vmul.f32 %v817_v36, %v785_v53 }
 0x727   :  { %v822_v38 = vmul.f32 %v820_v25, %v819_v37 }
 0x729   :  { %v825_v39 = vadd.f32 %v823_v29, %v822_v38 }
 0x72b   :  { %1026 = vmatmul.msk.f32.gmra.mxu1 %vm42_vm0, %v825_v39 }
 0x7a0   :  { %v866_v18 = vpop.f32.mrf.mxu1 }
 0x7a1   :  { %v867_v43 = vadd.f32 %v866_v18, %v826_v17 }
 0x7a3   :  { %v872_v14 = vmax.f32 %v867_v43, 0.0 }
 0x7a5   :  { %1027 = vmatmul.msk.f32.vlgmr.msra.gmra.mxu2 %vm875_vm2, %v872_v14 }
 0x7a8   :  { %v869_v15 = vpop.f32.mrf.mxu1 }
 0x7a9   :  { %v870_v11 = vadd.f32 %v869_v15, %v826_v17 }
 0x7ab   :  { %v873_v44 = vmax.f32 %v870_v11, 0.0 }
 0x7ad   :  { %1028 = vmatmul.msk.f32.gmra.mxu2 %vm875_vm2, %v873_v44 }
 0x828   :  { %v899_v46 = vpop.f32.mrf.mxu2 }
 0x829   :  { %v900_v33 = vadd.f32 %v899_v46, %v874_v45 }
 0x82b   :  { %v905_v47 = vadd.f32 %v900_v33, %v824_v34 }
 0x82d   :  { %v907_v8 = vsel %vm42_vm0, %v905_v47, 0.0 }
 0x82e   :  { %908 = vadd.xlane.f32.xlu0 %v907_v8 }
 0x830   :  { %v902_v48 = vpop.f32.mrf.mxu2 }
 0x831   :  { %v903_v49 = vadd.f32 %v902_v48, %v874_v45 }
 0x833   :  { %v906_v50 = vadd.f32 %v903_v49, %v825_v39 }
 0x835   :  { %v910_v51 = vsel %vm42_vm0, %v906_v50, 0.0 }
 0x836   :  { %911 = vadd.xlane.f32.xlu0 %v910_v51 }
 0x8a1   :  { %v909_v52 = vpop.xlane.xlu0 %908 }
 0x8a2   :  { %v913_v53 = vmul.f32 %v909_v52, %v1400_v55 }
 0x8a4   :  { %v915_v54 = vsub.f32 %v905_v47, %v913_v53 }
 0x8a6   :  { %v917_v6 = vmul.f32 %v915_v54, %v915_v54 }
 0x8a8   :  { %v919_v56 = vsel %vm42_vm0, %v917_v6, 0.0 }
 0x8a9   :  { %920 = vadd.xlane.f32.xlu0 %v919_v56  ;;  %v912_v57 = vpop.xlane.xlu0 %911 }
 0x8aa   :  { %v914_v58 = vmul.f32 %v912_v57, %v1400_v55 }
 0x8ac   :  { %v916_v7 = vsub.f32 %v906_v50, %v914_v58 }
 0x8ae   :  { %v918_v0 = vmul.f32 %v916_v7, %v916_v7 }
 0x8b0   :  { %v922_v1 = vsel %vm42_vm0, %v918_v0, 0.0 }
 0x8b1   :  { %923 = vadd.xlane.f32.xlu1 %v922_v1 }
 0x91c   :  { %v921_v2 = vpop.xlane.xlu0 %920 }
 0x91d   :  { %v925_v59 = vmul.f32 %v921_v2, %v1400_v55 }
 0x91f   :  { %v927_v3 = vadd.f32 1e-05, %v925_v59 }
 0x921   :  { %1119 = vrsqrt.f32 %v927_v3  ;;  %vm935_vm4 = vweird.f32 %v927_v3 }
 0x924   :  { %v924_v4 = vpop.xlane.xlu1 %923 }
 0x925   :  { %v926_v5 = vmul.f32 %v924_v4, %v1400_v55 }
 0x927   :  { %v1120_v60 = vpop.eup %1119  ;;  %v928_v61 = vadd.f32 1e-05, %v926_v5 }
 0x928   :  { %v930_v62 = vmul.f32 %v1120_v60, %v927_v3  ;;  %vm936_vm3 = vweird.f32 %v1120_v60 }
 0x929   :  { %1121 = vrsqrt.f32 %v928_v61  ;;  %vm937_vm5 = vmor %vm935_vm4, %vm936_vm3  ;;  %vm945_vm7 = vweird.f32 %v928_v61 }
 0x92a   :  { %v931_v63 = vmul.f32 %v1120_v60, %v930_v62 }
 0x92c   :  { %v932_v9 = vmul.f32 0.5, %v931_v63 }
 0x92e   :  { %v933_v10 = vsub.f32 1.5, %v932_v9 }
 0x92f   :  { %v1122_v12 = vpop.eup %1121 }
 0x930   :  { %v934_v16 = vmul.f32 %v1120_v60, %v933_v10  ;;  %v940_v19 = vmul.f32 %v1122_v12, %v928_v61  ;;  %vm946_vm6 = vweird.f32 %v1122_v12 }
 0x931   :  { %vm947_vm8 = vmor %vm945_vm7, %vm946_vm6 }
 0x932   :  { %v938_v21 = vsel %vm937_vm5, %v1120_v60, %v934_v16  ;;  %v941_v22 = vmul.f32 %v1122_v12, %v940_v19 }
 0x933   :  { %v949_v55 = vmul.f32 %v938_v21, %v915_v54 }
 0x934   :  { %v942_v24 = vmul.f32 0.5, %v941_v22 }
 0x935   :  { %v952_v25 = vmul.f32 %v951_v20, %v949_v55 }
 0x936   :  { %v943_v26 = vsub.f32 1.5, %v942_v24 }
 0x937   :  { %v955_v27 = vadd.f32 %v954_v23, %v952_v25 }
 0x938   :  { %v944_v28 = vmul.f32 %v1122_v12, %v943_v26 }
 0x939   :  { %957 = vst.msk [vmem:[#allocation2] sm:$0xff] %vm42_vm0, %v955_v27 }
 0x93a   :  { %v948_v29 = vsel %vm947_vm8, %v1122_v12, %v944_v28 }
 0x93b   :  { %v950_v30 = vmul.f32 %v948_v29, %v916_v7 }
 0x93d   :  { %v953_v31 = vmul.f32 %v951_v20, %v950_v30 }
 0x93f   :  { %v956_v32 = vadd.f32 %v954_v23, %v953_v31 }
 0x941   :  { %958 = vst.msk [vmem:[#allocation2 + $0x8] sm:$0xff] %vm42_vm0, %v956_v32 }
 0x942   :  { %971 = dma.vmem_to_hbm [thread:$0]  %s964_s19, 256, %s966_s22, [#allocation3], %s1186_s18, %s1186_s18, %s1181_s12  }
 0x943   :  { %1171 = dma.done.wait [#allocation3], 256  }
 0x944   :  { %1172 = vsyncadd [#allocation3], 4294967040 }
 0x945   :  { %1173 = dma.done.wait [#allocation5], 1024  }
 0x946   :  { %1174 = vsyncadd [#allocation5], 4294966272 }
 0x947   :  { %993 = vsyncpa [#allocation3], 1 }
 0x948   :  { %994 = vsyncpa [#allocation5], 1 }

</bundles_post_ra>
